<compile_context>
chip_gen: v7x
topology: tpu7x:2x2x1
jax: 0.10.0
libtpu: 0.0.40
codegen_flags: <defaults>
</compile_context>

<pallas_src>
import math
import functools

import jax
import jax.numpy as jnp
from jax.experimental import pallas as pl
from jax.experimental.pallas import tpu as pltpu

# ---- model hyper-params (small, consistent with the module's config) -------
B, S, H = 2, 8, 32          # batch, seq_len, hidden_size
NUM_HEADS = 4
INTER = 4 * H               # intermediate_size = 128
LN_EPS = 1e-12              # BertLayerNorm eps
NEG_INF = -1e9              # cross-batch score block


def _layer_norm_rows(v, gamma, beta):
    """LayerNorm over the last (feature / lane) axis of a token-major tile."""
    mu = jnp.mean(v, axis=-1, keepdims=True)
    var = jnp.mean((v - mu) ** 2, axis=-1, keepdims=True)
    return (v - mu) * jax.lax.rsqrt(var + LN_EPS) * gamma + beta


def _gelu(v):
    # TODO(synk): HF BERT "gelu" is erf-based; erf has no clean Mosaic lowering,
    # so the tanh approximation (EUP tanh) is used here; deviation ~1e-3.
    c = 0.7978845608028654  # sqrt(2/pi)
    return 0.5 * v * (1.0 + jnp.tanh(c * (v + 0.044715 * v * v * v)))


def bert_layer_kernel(x_ref, km_ref, wqkv_ref, bqkv_ref, wo_ref, wi_ref,
                      w2_ref, rp_ref, bi_ref, o_ref, *,
                      num_heads, head_dim, seq_len):
    """Whole layer, whole batch, single invocation (grid=())."""
    f32 = jnp.float32
    x = x_ref[...]                               # [T, H] token-major
    tok, hid = x.shape

    # ---- additive [T, T] mask, built fully in-kernel -------------------------
    # per-key additive mask inside a batch, NEG_INF across batches, so one
    # softmax over all T keys equals the per-batch softmax exactly.
    key_add = km_ref[...]                        # [1, T]
    q_idx = jax.lax.broadcasted_iota(jnp.int32, (tok, tok), 0)
    k_idx = jax.lax.broadcasted_iota(jnp.int32, (tok, tok), 1)
    # q//S == k//S  <=>  (q < m) == (k < m) for every batch boundary m
    same = None
    for m in range(seq_len, tok, seq_len):       # unrolled: B-1 tiny compares
        eq_m = ((q_idx < m) & (k_idx < m)) | ((q_idx >= m) & (k_idx >= m))
        same = eq_m if same is None else same & eq_m
    mask = key_add if same is None else jnp.where(same, key_add, f32(NEG_INF))

    # ---- fused QKV projection: one MXU issue, feature-major result -----------
    # qkvT[o, t] = sum_h Wqkv[o, h] * x[t, h]   (NT contraction, no transpose)
    qkvT = jax.lax.dot_general(wqkv_ref[...], x, (((1,), (1,)), ((), ())),
                               preferred_element_type=f32) + bqkv_ref[...]
    scale = 1.0 / math.sqrt(head_dim)
    qT = qkvT[:hid] * scale                      # fold 1/sqrt(D) into Q ([H,T])
    kT = qkvT[hid:2 * hid]
    vT = qkvT[2 * hid:]
    # heads live on the sublane axis -> leading-dim split, no lane shuffles
    qg = qT.reshape(num_heads, head_dim, tok)    # [G, D, T]
    kg = kT.reshape(num_heads, head_dim, tok)
    vg = vT.reshape(num_heads, head_dim, tok)

    # ---- scores / softmax / context: 2 head-batched dot_generals -------------
    # transposed-LHS contraction over d: no explicit swapaxes / relayout copy
    s = jnp.einsum("gdq,gdk->gqk", qg, kg, preferred_element_type=f32)
    s = s + mask                                 # broadcasts to [G, T, T]
    s = s - jnp.max(s, axis=-1, keepdims=True)
    p = jnp.exp(s)
    p = p * pl.reciprocal(jnp.sum(p, axis=-1, keepdims=True), approx=False)
    # context lands directly in feature-major layout: [G, D, T] -> [H, T]
    ctxT = jnp.einsum("gdk,gqk->gdq", vg, p,
                      preferred_element_type=f32).reshape(hid, tok)

    # ---- BertSelfOutput: dense flips to token-major, +residual, LayerNorm ----
    rp = rp_ref[...]                             # [6, H] packed bias/LN rows
    attn = jax.lax.dot_general(ctxT, wo_ref[...], (((0,), (0,)), ((), ())),
                               preferred_element_type=f32)          # [T, H]
    attn = _layer_norm_rows(attn + rp[0:1, :] + x, rp[1:2, :], rp[2:3, :])

    # ---- BertIntermediate: lane-dense [T, INTER] GELU ------------------------
    inter = _gelu(jnp.dot(attn, wi_ref[...], preferred_element_type=f32)
                  + bi_ref[...])

    # ---- removedResidualConnectionBertOutput: dense -> LayerNorm, NO residual
    out = jnp.dot(inter, w2_ref[...], preferred_element_type=f32) + rp[3:4, :]
    o_ref[...] = _layer_norm_rows(out, rp[4:5, :], rp[5:6, :])


@functools.partial(jax.jit, static_argnames=("num_heads",))
def removed_residual_bert_layer(x, attention_mask, params, *, num_heads=NUM_HEADS):
    b, s, h = x.shape
    t = b * s
    head_dim = h // num_heads

    x_tok = x.reshape(t, h)                      # token-major; free reshape
    # TODO(synk): only per-key additive masks ((B,1,S) or (B,1,1,S)) are
    # supported; per-query 2D decoder masks would need a different path.
    key_mask = attention_mask.reshape(1, t).astype(jnp.float32)

    # --- parameter packing: torch layouts in, kernel-friendly layouts out ----
    w_qkv = jnp.concatenate([params["wq"], params["wk"], params["wv"]], axis=0)
    b_qkv = jnp.concatenate([params["bq"], params["bk"],
                             params["bv"]]).reshape(3 * h, 1)
    wo_t = params["wo"].T                        # [in, out]
    wi_t = params["wi"].T                        # [H, INTER]
    w2_t = params["w2"].T                        # [INTER, H]
    rows = jnp.stack([params["bo"], params["ln1_g"], params["ln1_b"],
                      params["b2"], params["ln2_g"], params["ln2_b"]])  # [6, H]
    bi_row = params["bi"].reshape(1, -1)         # [1, INTER]

    kernel = functools.partial(bert_layer_kernel, num_heads=num_heads,
                               head_dim=head_dim, seq_len=s)
    vmem = pl.BlockSpec(memory_space=pltpu.MemorySpace.VMEM)
    out2d = pl.pallas_call(
        kernel,
        out_shape=jax.ShapeDtypeStruct((t, h), jnp.float32),
        in_specs=[vmem] * 9,
        out_specs=vmem,
    )(x_tok, key_mask, w_qkv, b_qkv, wo_t, wi_t, w2_t, rows, bi_row)
    return out2d.reshape(b, s, h)


# ---------------- pure-JAX reference (same math) for a sanity check ----------
def reference(x, mask, p):
    def lin(t, w, b):                            # torch nn.Linear: y = x @ W^T + b
        return t @ w.T + b
    q = lin(x, p["wq"], p["bq"])
    k = lin(x, p["wk"], p["bk"])
    v = lin(x, p["wv"], p["bv"])

    def split(t):
        return t.reshape(B, S, NUM_HEADS, H // NUM_HEADS).transpose(0, 2, 1, 3)

    qh, kh, vh = split(q), split(k), split(v)
    s = jnp.einsum("bhqd,bhkd->bhqk", qh, kh) / math.sqrt(H // NUM_HEADS)
    s = s + mask[:, None, :, :]                  # per-key additive mask
    pattn = jax.nn.softmax(s, axis=-1)
    ctx = jnp.einsum("bhqk,bhkd->bhqd", pattn, vh)
    ctx = ctx.transpose(0, 2, 1, 3).reshape(B, S, H)
    attn_out = _layer_norm_rows(lin(ctx, p["wo"], p["bo"]) + x,
                                p["ln1_g"], p["ln1_b"])
    inter = _gelu(lin(attn_out, p["wi"], p["bi"]))
    out_dense = lin(inter, p["w2"], p["b2"])
    return _layer_norm_rows(out_dense, p["ln2_g"], p["ln2_b"])   # no residual


if __name__ == "__main__":
    key = jax.random.PRNGKey(0)
    ks = jax.random.split(key, 20)

    def w(k, shape, scale=0.02):
        return scale * jax.random.normal(k, shape, jnp.float32)

    params = {  # torch nn.Linear layout: weight [out_features, in_features]
        "wq": w(ks[0], (H, H)),  "bq": w(ks[1], (H,)),
        "wk": w(ks[2], (H, H)),  "bk": w(ks[3], (H,)),
        "wv": w(ks[4], (H, H)),  "bv": w(ks[5], (H,)),
        "wo": w(ks[6], (H, H)),  "bo": w(ks[7], (H,)),
        "ln1_g": 1.0 + w(ks[8], (H,), 0.1), "ln1_b": w(ks[9], (H,), 0.1),
        "wi": w(ks[10], (INTER, H)), "bi": w(ks[11], (INTER,)),
        "w2": w(ks[12], (H, INTER)), "b2": w(ks[13], (H,)),
        "ln2_g": 1.0 + w(ks[14], (H,), 0.1), "ln2_b": w(ks[15], (H,), 0.1),
    }

    x = jax.random.normal(ks[16], (B, S, H), jnp.float32)
    # additive mask [B, 1, S]: batch 1 has its last 2 key positions masked out
    attention_mask = jnp.zeros((B, 1, S), jnp.float32)
    attention_mask = attention_mask.at[1, 0, S - 2:].set(-10000.0)

    out = removed_residual_bert_layer(x, attention_mask, params)
    jax.block_until_ready(out)

    ref = reference(x, attention_mask, params)
    assert out.shape == (B, S, H)
    err = float(jnp.max(jnp.abs(out - ref)))
    assert err < 3e-3, f"kernel/reference mismatch: {err}"
    print("KERNEL_OK")
</pallas_src>

<mosaic_0001>
module attributes {stable_mosaic.version = 11 : i64} {
  func.func @bert_layer_kernel(%arg0: memref<16x32xf32, #tpu.memory_space<vmem>>, %arg1: memref<1x16xf32, #tpu.memory_space<vmem>>, %arg2: memref<96x32xf32, #tpu.memory_space<vmem>>, %arg3: memref<96x1xf32, #tpu.memory_space<vmem>>, %arg4: memref<32x32xf32, #tpu.memory_space<vmem>>, %arg5: memref<32x128xf32, #tpu.memory_space<vmem>>, %arg6: memref<128x32xf32, #tpu.memory_space<vmem>>, %arg7: memref<6x32xf32, #tpu.memory_space<vmem>>, %arg8: memref<1x128xf32, #tpu.memory_space<vmem>>, %arg9: memref<16x32xf32, #tpu.memory_space<vmem>>) attributes {dimension_semantics = [], scalar_prefetch = 0 : i64, scratch_operands = 0 : i64, tpu.core_type = #tpu.core_type<tc>} {
    %c0 = arith.constant 0 : index
    %c0_0 = arith.constant 0 : index
    %0 = vector.load %arg0[%c0, %c0_0] : memref<16x32xf32, #tpu.memory_space<vmem>>, vector<16x32xf32>
    %c0_1 = arith.constant 0 : index
    %c0_2 = arith.constant 0 : index
    %1 = vector.load %arg1[%c0_1, %c0_2] : memref<1x16xf32, #tpu.memory_space<vmem>>, vector<1x16xf32>
    %2 = tpu.iota {dimensions = array<i32: 0>} : vector<16x16xi32>
    %3 = tpu.iota {dimensions = array<i32: 1>} : vector<16x16xi32>
    %c8_i32 = arith.constant 8 : i32
    %4 = vector.broadcast %c8_i32 : i32 to vector<16x16xi32>
    %5 = arith.cmpi slt, %2, %4 : vector<16x16xi32>
    %c8_i32_3 = arith.constant 8 : i32
    %6 = vector.broadcast %c8_i32_3 : i32 to vector<16x16xi32>
    %7 = arith.cmpi slt, %3, %6 : vector<16x16xi32>
    %8 = arith.andi %5, %7 : vector<16x16xi1>
    %c8_i32_4 = arith.constant 8 : i32
    %9 = vector.broadcast %c8_i32_4 : i32 to vector<16x16xi32>
    %10 = arith.cmpi sge, %2, %9 : vector<16x16xi32>
    %c8_i32_5 = arith.constant 8 : i32
    %11 = vector.broadcast %c8_i32_5 : i32 to vector<16x16xi32>
    %12 = arith.cmpi sge, %3, %11 : vector<16x16xi32>
    %13 = arith.andi %10, %12 : vector<16x16xi1>
    %14 = arith.ori %8, %13 : vector<16x16xi1>
    %cst = arith.constant -1.000000e+09 : f32
    %15 = vector.shape_cast %1 : vector<1x16xf32> to vector<1x16xf32>
    %16 = vector.broadcast %15 : vector<1x16xf32> to vector<16x16xf32>
    %17 = vector.broadcast %cst : f32 to vector<16x16xf32>
    %18 = arith.select %14, %16, %17 : vector<16x16xi1>, vector<16x16xf32>
    %c0_6 = arith.constant 0 : index
    %c0_7 = arith.constant 0 : index
    %19 = vector.load %arg2[%c0_6, %c0_7] : memref<96x32xf32, #tpu.memory_space<vmem>>, vector<96x32xf32>
    %cst_8 = arith.constant dense<0.000000e+00> : vector<96x16xf32>
    %20 = tpu.matmul %19, %0, %cst_8 {dimension_numbers = #tpu.dot_dimension_numbers<[1], [1], [0], [0], [0, 0, 1, 0], [], []>} : vector<96x32xf32>, vector<16x32xf32>, vector<96x16xf32> -> vector<96x16xf32>
    %c0_9 = arith.constant 0 : index
    %c0_10 = arith.constant 0 : index
    %21 = vector.load %arg3[%c0_9, %c0_10] : memref<96x1xf32, #tpu.memory_space<vmem>>, vector<96x1xf32>
    %22 = vector.broadcast %21 : vector<96x1xf32> to vector<96x16xf32>
    %23 = arith.addf %20, %22 : vector<96x16xf32>
    %24 = vector.extract_strided_slice %23 {offsets = [0, 0], sizes = [32, 16], strides = [1, 1]} : vector<96x16xf32> to vector<32x16xf32>
    %cst_11 = arith.constant 0.353553385 : f32
    %25 = vector.broadcast %cst_11 : f32 to vector<32x16xf32>
    %26 = arith.mulf %24, %25 : vector<32x16xf32>
    %27 = vector.extract_strided_slice %23 {offsets = [32, 0], sizes = [32, 16], strides = [1, 1]} : vector<96x16xf32> to vector<32x16xf32>
    %28 = vector.extract_strided_slice %23 {offsets = [64, 0], sizes = [32, 16], strides = [1, 1]} : vector<96x16xf32> to vector<32x16xf32>
    %29 = vector.shape_cast %26 : vector<32x16xf32> to vector<4x8x16xf32>
    %30 = vector.shape_cast %27 : vector<32x16xf32> to vector<4x8x16xf32>
    %31 = vector.shape_cast %28 : vector<32x16xf32> to vector<4x8x16xf32>
    "tpu.trace_start"() <{level = 10 : i32, message = "gdq,gdk->gqk"}> : () -> ()
    %cst_12 = arith.constant dense<0.000000e+00> : vector<4x16x16xf32>
    %32 = tpu.matmul %29, %30, %cst_12 {dimension_numbers = #tpu.dot_dimension_numbers<[1], [1], [2], [2], [0, 0, 0, 2, 1, 2], [0], [0]>} : vector<4x8x16xf32>, vector<4x8x16xf32>, vector<4x16x16xf32> -> vector<4x16x16xf32>
    "tpu.trace_stop"() : () -> ()
    %33 = vector.shape_cast %18 : vector<16x16xf32> to vector<1x16x16xf32>
    %34 = vector.broadcast %33 : vector<1x16x16xf32> to vector<4x16x16xf32>
    %35 = arith.addf %32, %34 : vector<4x16x16xf32>
    %cst_13 = arith.constant dense<0xFF800000> : vector<4x16xf32>
    %36 = vector.multi_reduction <maximumf>, %35, %cst_13 [2] : vector<4x16x16xf32> to vector<4x16xf32>
    %37 = vector.shape_cast %36 : vector<4x16xf32> to vector<4x16x1xf32>
    %38 = vector.broadcast %37 : vector<4x16x1xf32> to vector<4x16x16xf32>
    %39 = arith.subf %35, %38 : vector<4x16x16xf32>
    %40 = math.exp %39 : vector<4x16x16xf32>
    %cst_14 = arith.constant dense<0.000000e+00> : vector<4x16xf32>
    %41 = vector.multi_reduction <add>, %40, %cst_14 [2] : vector<4x16x16xf32> to vector<4x16xf32>
    %42 = vector.shape_cast %41 : vector<4x16xf32> to vector<4x16x1xf32>
    %43 = tpu.reciprocal %42 : vector<4x16x1xf32> -> vector<4x16x1xf32>
    %44 = vector.broadcast %43 : vector<4x16x1xf32> to vector<4x16x16xf32>
    %45 = arith.mulf %40, %44 : vector<4x16x16xf32>
    "tpu.trace_start"() <{level = 10 : i32, message = "gdk,gqk->gdq"}> : () -> ()
    %cst_15 = arith.constant dense<0.000000e+00> : vector<4x8x16xf32>
    %46 = tpu.matmul %31, %45, %cst_15 {dimension_numbers = #tpu.dot_dimension_numbers<[2], [2], [1], [1], [0, 0, 0, 1, 1, 1], [0], [0]>} : vector<4x8x16xf32>, vector<4x16x16xf32>, vector<4x8x16xf32> -> vector<4x8x16xf32>
    "tpu.trace_stop"() : () -> ()
    %47 = vector.shape_cast %46 : vector<4x8x16xf32> to vector<32x16xf32>
    %c0_16 = arith.constant 0 : index
    %c0_17 = arith.constant 0 : index
    %48 = vector.load %arg7[%c0_16, %c0_17] : memref<6x32xf32, #tpu.memory_space<vmem>>, vector<6x32xf32>
    %c0_18 = arith.constant 0 : index
    %c0_19 = arith.constant 0 : index
    %49 = vector.load %arg4[%c0_18, %c0_19] : memref<32x32xf32, #tpu.memory_space<vmem>>, vector<32x32xf32>
    %cst_20 = arith.constant dense<0.000000e+00> : vector<16x32xf32>
    %50 = tpu.matmul %47, %49, %cst_20 {dimension_numbers = #tpu.dot_dimension_numbers<[0], [0], [1], [1], [0, 1, 1, 1], [], []>} : vector<32x16xf32>, vector<32x32xf32>, vector<16x32xf32> -> vector<16x32xf32>
    %51 = vector.extract_strided_slice %48 {offsets = [0, 0], sizes = [1, 32], strides = [1, 1]} : vector<6x32xf32> to vector<1x32xf32>
    %52 = vector.broadcast %51 : vector<1x32xf32> to vector<16x32xf32>
    %53 = arith.addf %50, %52 : vector<16x32xf32>
    %54 = arith.addf %53, %0 : vector<16x32xf32>
    %55 = vector.extract_strided_slice %48 {offsets = [1, 0], sizes = [1, 32], strides = [1, 1]} : vector<6x32xf32> to vector<1x32xf32>
    %56 = vector.extract_strided_slice %48 {offsets = [2, 0], sizes = [1, 32], strides = [1, 1]} : vector<6x32xf32> to vector<1x32xf32>
    %cst_21 = arith.constant dense<0.000000e+00> : vector<16xf32>
    %57 = vector.multi_reduction <add>, %54, %cst_21 [1] : vector<16x32xf32> to vector<16xf32>
    %58 = vector.shape_cast %57 : vector<16xf32> to vector<16x1xf32>
    %cst_22 = arith.constant 3.200000e+01 : f32
    %59 = vector.broadcast %cst_22 : f32 to vector<16x1xf32>
    %60 = arith.divf %58, %59 : vector<16x1xf32>
    %61 = vector.broadcast %60 : vector<16x1xf32> to vector<16x32xf32>
    %62 = arith.subf %54, %61 : vector<16x32xf32>
    %63 = arith.mulf %62, %62 : vector<16x32xf32>
    %cst_23 = arith.constant dense<0.000000e+00> : vector<16xf32>
    %64 = vector.multi_reduction <add>, %63, %cst_23 [1] : vector<16x32xf32> to vector<16xf32>
    %65 = vector.shape_cast %64 : vector<16xf32> to vector<16x1xf32>
    %cst_24 = arith.constant 3.200000e+01 : f32
    %66 = vector.broadcast %cst_24 : f32 to vector<16x1xf32>
    %67 = arith.divf %65, %66 : vector<16x1xf32>
    %68 = vector.broadcast %60 : vector<16x1xf32> to vector<16x32xf32>
    %69 = arith.subf %54, %68 : vector<16x32xf32>
    %cst_25 = arith.constant 9.99999996E-13 : f32
    %70 = vector.broadcast %cst_25 : f32 to vector<16x1xf32>
    %71 = arith.addf %67, %70 : vector<16x1xf32>
    %72 = math.rsqrt %71 : vector<16x1xf32>
    %73 = vector.broadcast %72 : vector<16x1xf32> to vector<16x32xf32>
    %74 = arith.mulf %69, %73 : vector<16x32xf32>
    %75 = vector.broadcast %55 : vector<1x32xf32> to vector<16x32xf32>
    %76 = arith.mulf %74, %75 : vector<16x32xf32>
    %77 = vector.broadcast %56 : vector<1x32xf32> to vector<16x32xf32>
    %78 = arith.addf %76, %77 : vector<16x32xf32>
    %c0_26 = arith.constant 0 : index
    %c0_27 = arith.constant 0 : index
    %79 = vector.load %arg5[%c0_26, %c0_27] : memref<32x128xf32, #tpu.memory_space<vmem>>, vector<32x128xf32>
    %cst_28 = arith.constant dense<0.000000e+00> : vector<16x128xf32>
    %80 = tpu.matmul %78, %79, %cst_28 {dimension_numbers = #tpu.dot_dimension_numbers<[1], [0], [0], [1], [0, 0, 1, 1], [], []>} : vector<16x32xf32>, vector<32x128xf32>, vector<16x128xf32> -> vector<16x128xf32>
    %c0_29 = arith.constant 0 : index
    %c0_30 = arith.constant 0 : index
    %81 = vector.load %arg8[%c0_29, %c0_30] : memref<1x128xf32, #tpu.memory_space<vmem>>, vector<1x128xf32>
    %82 = vector.broadcast %81 : vector<1x128xf32> to vector<16x128xf32>
    %83 = arith.addf %80, %82 : vector<16x128xf32>
    %cst_31 = arith.constant 5.000000e-01 : f32
    %84 = vector.broadcast %cst_31 : f32 to vector<16x128xf32>
    %85 = arith.mulf %84, %83 : vector<16x128xf32>
    %cst_32 = arith.constant 4.471500e-02 : f32
    %86 = vector.broadcast %cst_32 : f32 to vector<16x128xf32>
    %87 = arith.mulf %86, %83 : vector<16x128xf32>
    %88 = arith.mulf %87, %83 : vector<16x128xf32>
    %89 = arith.mulf %88, %83 : vector<16x128xf32>
    %90 = arith.addf %83, %89 : vector<16x128xf32>
    %cst_33 = arith.constant 0.797884583 : f32
    %91 = vector.broadcast %cst_33 : f32 to vector<16x128xf32>
    %92 = arith.mulf %91, %90 : vector<16x128xf32>
    %93 = math.tanh %92 : vector<16x128xf32>
    %cst_34 = arith.constant 1.000000e+00 : f32
    %94 = vector.broadcast %cst_34 : f32 to vector<16x128xf32>
    %95 = arith.addf %94, %93 : vector<16x128xf32>
    %96 = arith.mulf %85, %95 : vector<16x128xf32>
    %c0_35 = arith.constant 0 : index
    %c0_36 = arith.constant 0 : index
    %97 = vector.load %arg6[%c0_35, %c0_36] : memref<128x32xf32, #tpu.memory_space<vmem>>, vector<128x32xf32>
    %cst_37 = arith.constant dense<0.000000e+00> : vector<16x32xf32>
    %98 = tpu.matmul %96, %97, %cst_37 {dimension_numbers = #tpu.dot_dimension_numbers<[1], [0], [0], [1], [0, 0, 1, 1], [], []>} : vector<16x128xf32>, vector<128x32xf32>, vector<16x32xf32> -> vector<16x32xf32>
    %99 = vector.extract_strided_slice %48 {offsets = [3, 0], sizes = [1, 32], strides = [1, 1]} : vector<6x32xf32> to vector<1x32xf32>
    %100 = vector.broadcast %99 : vector<1x32xf32> to vector<16x32xf32>
    %101 = arith.addf %98, %100 : vector<16x32xf32>
    %102 = vector.extract_strided_slice %48 {offsets = [4, 0], sizes = [1, 32], strides = [1, 1]} : vector<6x32xf32> to vector<1x32xf32>
    %103 = vector.extract_strided_slice %48 {offsets = [5, 0], sizes = [1, 32], strides = [1, 1]} : vector<6x32xf32> to vector<1x32xf32>
    %cst_38 = arith.constant dense<0.000000e+00> : vector<16xf32>
    %104 = vector.multi_reduction <add>, %101, %cst_38 [1] : vector<16x32xf32> to vector<16xf32>
    %105 = vector.shape_cast %104 : vector<16xf32> to vector<16x1xf32>
    %cst_39 = arith.constant 3.200000e+01 : f32
    %106 = vector.broadcast %cst_39 : f32 to vector<16x1xf32>
    %107 = arith.divf %105, %106 : vector<16x1xf32>
    %108 = vector.broadcast %107 : vector<16x1xf32> to vector<16x32xf32>
    %109 = arith.subf %101, %108 : vector<16x32xf32>
    %110 = arith.mulf %109, %109 : vector<16x32xf32>
    %cst_40 = arith.constant dense<0.000000e+00> : vector<16xf32>
    %111 = vector.multi_reduction <add>, %110, %cst_40 [1] : vector<16x32xf32> to vector<16xf32>
    %112 = vector.shape_cast %111 : vector<16xf32> to vector<16x1xf32>
    %cst_41 = arith.constant 3.200000e+01 : f32
    %113 = vector.broadcast %cst_41 : f32 to vector<16x1xf32>
    %114 = arith.divf %112, %113 : vector<16x1xf32>
    %115 = vector.broadcast %107 : vector<16x1xf32> to vector<16x32xf32>
    %116 = arith.subf %101, %115 : vector<16x32xf32>
    %cst_42 = arith.constant 9.99999996E-13 : f32
    %117 = vector.broadcast %cst_42 : f32 to vector<16x1xf32>
    %118 = arith.addf %114, %117 : vector<16x1xf32>
    %119 = math.rsqrt %118 : vector<16x1xf32>
    %120 = vector.broadcast %119 : vector<16x1xf32> to vector<16x32xf32>
    %121 = arith.mulf %116, %120 : vector<16x32xf32>
    %122 = vector.broadcast %102 : vector<1x32xf32> to vector<16x32xf32>
    %123 = arith.mulf %121, %122 : vector<16x32xf32>
    %124 = vector.broadcast %103 : vector<1x32xf32> to vector<16x32xf32>
    %125 = arith.addf %123, %124 : vector<16x32xf32>
    %c0_43 = arith.constant 0 : index
    %c0_44 = arith.constant 0 : index
    %126 = vector.load %arg9[%c0_43, %c0_44] : memref<16x32xf32, #tpu.memory_space<vmem>>, vector<16x32xf32>
    tpu.vector_store %arg9[%c0_43, %c0_44], %125 {strides = array<i32>} : memref<16x32xf32, #tpu.memory_space<vmem>>, vector<16x32xf32>,
    return
  }
}

</mosaic_0001>

<bundles_post_ra>
// kernel: removed_residual_bert_layer.1
= control target key start
LH: loop header
LB: loop body
LE: loop exit
PB: predicated region body
PF: predicated region fallthrough
CT: control target
= control target key end

     0   :  { %vm145_vm0 = vcmask 261120   ;;  %v1983_v4 = vmov 0   ;;  %s2323_s0 = inlined_call_operand.vmem [shape: f32[16,32], index: 0, kind: input, shape index: {}]   ;;  %s2324_s1 = inlined_call_operand.vmem [shape: f32[1,16], index: 1, kind: input, shape index: {}]   ;;  %s2325_s2 = inlined_call_operand.vmem [shape: f32[96,32], index: 2, kind: input, shape index: {}]   ;;  %s2326_s3 = inlined_call_operand.vmem [shape: f32[96,1], index: 3, kind: input, shape index: {}]   ;;  %s2327_s4 = inlined_call_operand.vmem [shape: f32[32,32], index: 4, kind: input, shape index: {}]   ;;  %s2328_s5 = inlined_call_operand.vmem [shape: f32[32,128], index: 5, kind: input, shape index: {}]   ;;  %s2329_s6 = inlined_call_operand.vmem [shape: f32[128,32], index: 6, kind: input, shape index: {}]   ;;  %s2330_s7 = inlined_call_operand.vmem [shape: f32[6,32], index: 7, kind: input, shape index: {}]   ;;  %s2331_s8 = inlined_call_operand.vmem [shape: f32[1,128], index: 8, kind: input, shape index: {}]   ;;  %s2332_s9 = inlined_call_operand.hbm [shape: f32[16,32], index: 9, kind: output, shape index: {}]  }
   0x1   :  { %v2043_v0 = vld [vmem:[%s2323_s0] sm:$0xff]  ;;  %v2048_v1 = vld [vmem:[%s2323_s0 + $0x8] sm:$0xff]  ;;  %vm1835_vm1 = vmpackc.low %vm145_vm0, %vm145_vm0  ;;  %1913 = vset.pattern.permute.xlu0 %v1983_v4  ;;  %1914 = vset.pattern.permute.xlu1 %v1983_v4 }
   0x2   :  { %v61_v2 = vld [vmem:[%s2325_s2] sm:$0xff]  ;;  %v1834_v3 = vpack.c.bf16 %v2048_v1, %v2043_v0  ;;  %v75_v6 = vld [vmem:[%s2326_s3 + $0x10] sm:$0xff]  ;;  %v74_v7 = vld [vmem:[%s2326_s3 + $0x8] sm:$0xff] }
   0x3   :  { %1711 = vmatprep.mubr.msk.f32.mxu0 %vm145_vm0, %v61_v2  ;;  %v73_v5 = vld [vmem:[%s2326_s3] sm:$0xff]  ;;  %97 = vperm.xlu1 %1914, %v75_v6   ;;  %v76_v8 = vld [vmem:[%s2326_s3 + $0x18] sm:$0xff] }
   0x4   :  { %1836 = vmatprep.subr.msk.bf16.mxu0 %vm1835_vm1, %v1834_v3  ;;  %1904 = vmatprep.subr.msk.bf16.mxu1 %vm1835_vm1, %v1834_v3 }
   0x5   :  { %1839 = vmatpush3.bf16.xpose.msk.msra.mxu0 %vm1835_vm1, %v1834_v3  ;;  %87 = vperm.xlu0 %1913, %v73_v5  }
   0x6   :  { %1905 = vmatpush3.bf16.xpose.msk.msra.mxu1 %vm1835_vm1, %v1834_v3 }
   0x7   :  { %14 = vsyncpa [#allocation3], 0  ;;  %v62_v9 = vld [vmem:[%s2325_s2 + $0x8] sm:$0xff]  ;;  %v63_v10 = vld [vmem:[%s2325_s2 + $0x10] sm:$0xff]  ;;  %102 = vperm.xlu1 %1914, %v76_v8   ;;  %vm349_vm2 = vcmask 64512   ;;  %v39_v2 = vlaneseq  ;;  %vm770_vm5 = vcmask 130048  }
   0x8   :  { %v77_v11 = vld [vmem:[%s2326_s3 + $0x20] sm:$0xff]  ;;  %v78_v12 = vld [vmem:[%s2326_s3 + $0x28] sm:$0xff]  ;;  %v64_v13 = vld [vmem:[%s2325_s2 + $0x18] sm:$0xff]  ;;  %vm1985_vm6 = vmmov 0  }
   0x9   :  { %92 = vperm.xlu0 %1913, %v74_v7   ;;  %v65_v14 = vld [vmem:[%s2325_s2 + $0x20] sm:$0xff]  ;;  %v79_v15 = vld [vmem:[%s2326_s3 + $0x30] sm:$0xff]  ;;  %v80_v16 = vld [vmem:[%s2326_s3 + $0x38] sm:$0xff]  ;;  %v40_v3 = vand.u32 127, %v39_v2 }
   0xa   :  { %v66_v17 = vld [vmem:[%s2325_s2 + $0x28] sm:$0xff]  ;;  %v67_v18 = vld [vmem:[%s2325_s2 + $0x30] sm:$0xff]  ;;  %v68_v19 = vld [vmem:[%s2325_s2 + $0x38] sm:$0xff] }
   0xb   :  { %112 = vperm.xlu1 %1914, %v78_v12   ;;  %v69_v20 = vld [vmem:[%s2325_s2 + $0x40] sm:$0xff]  ;;  %v70_v21 = vld [vmem:[%s2325_s2 + $0x48] sm:$0xff]  ;;  %v71_v22 = vld [vmem:[%s2325_s2 + $0x50] sm:$0xff]  ;;  %vm48_vm3 = vcmp.ge.s32.totalorder %v40_v3, 8  ;;  %vm43_vm4 = vcmp.lt.s32.totalorder %v40_v3, 8 }
   0xc   :  { %1712 = vmatmul.mubr.msk.f32.vlgmr.msra.gmra.mrb[0].mxu0 %vm145_vm0, %v62_v9  ;;  %1723 = vmatprep.mubr.msk.f32.mxu1 %vm145_vm0, %v69_v20  ;;  %v72_v23 = vld [vmem:[%s2325_s2 + $0x58] sm:$0xff]  ;;  %v1599_v4 = vld [vmem:[%s2324_s1] ss:$0 sm:$0xff]  ;;  %vm2178_vm7 = vmpackc.low %vm770_vm5, %vm770_vm5 }
   0xd   :  { %1714 = vmatprep.mubr.msk.f32.mxu0 %vm145_vm0, %v63_v10  ;;  %107 = vperm.xlu0 %1913, %v77_v11   ;;  %v60_v5 = vsel %vm48_vm3, %v1599_v4, -1e+09  ;;  %v59_v6 = vsel %vm43_vm4, %v1599_v4, -1e+09 }
   0xe   :  { %1724 = vmatmul.mubr.msk.f32.vlgmr.msra.gmra.mrb[0].mxu1 %vm145_vm0, %v70_v21 }
   0xf   :  { %122 = vperm.xlu1 %1914, %v80_v16   ;;  %1726 = vmatprep.mubr.msk.f32.mxu1 %vm145_vm0, %v71_v22 }
  0x10   :  { %1715 = vmatmul.mubr.msk.f32.gmra.mrb[2].mxu0 %vm145_vm0, %v64_v13 }
  0x11   :  { %1717 = vmatprep.mubr.msk.f32.mxu0 %vm145_vm0, %v65_v14  ;;  %117 = vperm.xlu0 %1913, %v79_v15  }
  0x12   :  { %1727 = vmatmul.mubr.msk.f32.gmra.mrb[2].mxu1 %vm145_vm0, %v72_v23 }
  0x14   :  { %1718 = vmatmul.mubr.msk.f32.gmra.mrb[4].mxu0 %vm145_vm0, %v66_v17 }
  0x15   :  { %1720 = vmatprep.mubr.msk.f32.mxu0 %vm145_vm0, %v67_v18 }
  0x18   :  { %1721 = vmatmul.mubr.msk.f32.gmra.mrb[6].mxu0 %vm145_vm0, %v68_v19 }
  0x82   :  { %v98_v25 = vpop.permute.xlu1 %97 }
  0x84   :  { %v88_v24 = vpop.permute.xlu0 %87 }
  0x86   :  { %v103_v34 = vpop.permute.xlu1 %102 }
  0x88   :  { %v93_v26 = vpop.permute.xlu0 %92 }
  0x8a   :  { %v113_v43 = vpop.permute.xlu1 %112 }
  0x8c   :  { %v108_v39 = vpop.permute.xlu0 %107 }
  0x8e   :  { %v123_v53 = vpop.permute.xlu1 %122 }
  0x90   :  { %v118_v52 = vpop.permute.xlu0 %117 }
  0xdf   :  { %v1713_v27 = vpop.f32.mrb[0].mxu0 }
  0xe0   :  { %v260_v28 = vadd.f32 %v1713_v27, %v93_v26  ;;  %v254_v29 = vpop.f32.mrb[1].mxu0 }
  0xe1   :  { %v255_v30 = vadd.f32 %v254_v29, %v88_v24  ;;  %v2126_v48 = vpop.f32.mrb[0].mxu1 }
  0xe2   :  { %v314_v31 = vmul.f32 0.35355338, %v260_v28  ;;  %v2128_v49 = vpop.f32.mrb[1].mxu1 }
  0xe3   :  { %v313_v32 = vmul.f32 0.35355338, %v255_v30  ;;  %v1716_v33 = vpop.f32.mrb[2].mxu0 }
  0xe4   :  { %431 = vxpose.xlu1.b32.start.end [1/1] (short) (narrow) %v314_v31, 16  ;;  %v264_v35 = vpop.f32.mrb[3].mxu0  ;;  %v270_v41 = vadd.f32 %v1716_v33, %v103_v34  ;;  %v82_v31 = vld [vmem:[%s2326_s3 + $0x48] sm:$0xff] }
  0xe5   :  { %v265_v36 = vadd.f32 %v264_v35, %v98_v25  ;;  %317 = vxpose.xlu0.b32.start.end [1/1] (short) (narrow) %v313_v32, 16  ;;  %v2130_v50 = vpop.f32.mrb[2].mxu1  ;;  %v81_v32 = vld [vmem:[%s2326_s3 + $0x40] sm:$0xff] }
  0xe6   :  { %v316_v47 = vmul.f32 0.35355338, %v270_v41  ;;  %v2132_v51 = vpop.f32.mrb[3].mxu1 }
  0xe7   :  { %v315_v37 = vmul.f32 0.35355338, %v265_v36  ;;  %v1719_v38 = vpop.f32.mrb[4].mxu0 }
  0xe8   :  { %v274_v40 = vpop.f32.mrb[5].mxu0  ;;  %v280_v44 = vadd.f32 %v1719_v38, %v113_v43 }
  0xe9   :  { %v275_v42 = vadd.f32 %v274_v40, %v108_v39 }
  0xea   :  { %544 = vxpose.xlu0.b32.start.end [1/1] (short) (narrow) %v315_v37, 16 }
  0xeb   :  { %v1722_v45 = vpop.f32.mrb[6].mxu0  ;;  %1729 = vmatprep.subr.mxu1 %v275_v42 }
  0xec   :  { %v284_v46 = vpop.f32.mrb[7].mxu0  ;;  %1730 = vmatpush3.msra.mxu1 %v275_v42  ;;  %v290_v60 = vadd.f32 %v1722_v45, %v123_v53 }
  0xed   :  { %1734 = vmatprep.subr.mxu1 %v280_v44  ;;  %v285_v57 = vadd.f32 %v284_v46, %v118_v52 }
  0xef   :  { %657 = vxpose.xlu0.b32.start.end [1/1] (short) (narrow) %v316_v47, 16 }
 0x164   :  { %v447_v55 = vpop.trf.xlu1 }
 0x165   :  { %v333_v54 = vpop.trf.xlu0 }
 0x166   :  { %1731 = vmatprep.mubr.msk.f32.mxu1 %vm349_vm2, %v333_v54 }
 0x168   :  { %v448_v58 = vpop.trf.xlu1 }
 0x169   :  { %v334_v56 = vpop.trf.xlu0 }
 0x16a   :  { %1732 = vmatmul.mubr.msk.f32.vlgmr.msra.gmra.mrb[4].mxu1 %vm349_vm2, %v334_v56 }
 0x16b   :  { %1735 = vmatpush3.msra.mxu1 %v280_v44  ;;  %1736 = vmatprep.mubr.msk.f32.mxu1 %vm349_vm2, %v447_v55 }
 0x16c   :  { %1739 = vmatprep.subr.mxu1 %v285_v57 }
 0x16d   :  { %v560_v59 = vpop.trf.xlu0 }
 0x16e   :  { %1737 = vmatmul.mubr.msk.f32.vlgmr.msra.gmra.mrb[6].mxu1 %vm349_vm2, %v448_v58 }
 0x16f   :  { %1740 = vmatpush3.msra.mxu1 %v285_v57  ;;  %1741 = vmatprep.mubr.msk.f32.mxu1 %vm349_vm2, %v560_v59 }
 0x170   :  { %1744 = vmatprep.subr.mxu1 %v290_v60 }
 0x171   :  { %v561_v61 = vpop.trf.xlu0 }
 0x172   :  { %1742 = vmatmul.mubr.msk.f32.vlgmr.msra.gmra.mrb[8].mxu1 %vm349_vm2, %v561_v61 }
 0x173   :  { %1745 = vmatpush3.msra.mxu1 %v290_v60 }
 0x175   :  { %v673_v62 = vpop.trf.xlu0 }
 0x176   :  { %1746 = vmatprep.mubr.msk.f32.mxu1 %vm349_vm2, %v673_v62 }
 0x179   :  { %v674_v63 = vpop.trf.xlu0 }
 0x17a   :  { %1747 = vmatmul.mubr.msk.f32.vlgmr.msra.gmra.mrb[10].mxu1 %vm349_vm2, %v674_v63 }
 0x23d   :  { %v1733_v7 = vpop.f32.mrb[4].mxu1 }
 0x23e   :  { %v428_v8 = vadd.f32 %v1733_v7, %v60_v5  ;;  %v422_v9 = vpop.f32.mrb[5].mxu1 }
 0x23f   :  { %v423_v10 = vadd.f32 %v422_v9, %v59_v6 }
 0x240   :  { %v774_v11 = vsel %vm770_vm5, %v428_v8, -inf }
 0x241   :  { %775 = vmax.xlane.f32.xlu1 %v774_v11  ;;  %v1738_v12 = vpop.f32.mrb[6].mxu1  ;;  %v771_v13 = vsel %vm770_vm5, %v423_v10, -inf }
 0x242   :  { %v541_v14 = vadd.f32 %v1738_v12, %v60_v5  ;;  %v535_v15 = vpop.f32.mrb[7].mxu1  ;;  %772 = vmax.xlane.f32.xlu0 %v771_v13 }
 0x243   :  { %v536_v16 = vadd.f32 %v535_v15, %v59_v6 }
 0x244   :  { %v780_v17 = vsel %vm770_vm5, %v541_v14, -inf }
 0x245   :  { %781 = vmax.xlane.f32.xlu1 %v780_v17  ;;  %v1743_v18 = vpop.f32.mrb[8].mxu1  ;;  %v777_v22 = vsel %vm770_vm5, %v536_v16, -inf  ;;  %v1984_v17 = vmov 0.0|0.0  }
 0x246   :  { %v648_v19 = vpop.f32.mrb[9].mxu1  ;;  %v654_v21 = vadd.f32 %v1743_v18, %v60_v5  ;;  %1840 = vmatprep.subr.bf16.mxu1 %v1984_v17  ;;  %1848 = vmatprep.subr.bf16.mxu0 %v1984_v17  ;;  %v84_v18 = vld [vmem:[%s2326_s3 + $0x58] sm:$0xff] }
 0x247   :  { %v649_v20 = vadd.f32 %v648_v19, %v59_v6  ;;  %v1986_v19 = vmov 0.0  }
 0x248   :  { %v786_v24 = vsel %vm770_vm5, %v654_v21, -inf  ;;  %1753 = vmatprep.mubr.msk.f32.mxu1 %vm1985_vm6, %v1986_v19  ;;  %1767 = vmatprep.mubr.msk.f32.mxu0 %vm1985_vm6, %v1986_v19 }
 0x249   :  { %778 = vmax.xlane.f32.xlu1 %v777_v22  ;;  %v783_v23 = vsel %vm770_vm5, %v649_v20, -inf }
 0x24a   :  { %784 = vmax.xlane.f32.xlu0 %v783_v23 }
 0x24d   :  { %787 = vmax.xlane.f32.xlu1 %v786_v24  ;;  %v1748_v25 = vpop.f32.mrb[10].mxu1 }
 0x24e   :  { %v767_v26 = vadd.f32 %v1748_v25, %v60_v5  ;;  %v761_v27 = vpop.f32.mrb[11].mxu1 }
 0x24f   :  { %v762_v28 = vadd.f32 %v761_v27, %v59_v6 }
 0x250   :  { %v792_v29 = vsel %vm770_vm5, %v767_v26, -inf }
 0x251   :  { %793 = vmax.xlane.f32.xlu1 %v792_v29  ;;  %v789_v30 = vsel %vm770_vm5, %v762_v28, -inf }
 0x252   :  { %790 = vmax.xlane.f32.xlu0 %v789_v30 }
 0x262   :  { %132 = vperm.xlu1 %1914, %v82_v31  }
 0x268   :  { %127 = vperm.xlu0 %1913, %v81_v32   ;;  %v1339_v32 = vld [vmem:[%s2328_s5 + $0x8] sm:$0xff] }
 0x2ce   :  { %v776_v33 = vpop.xlane.xlu1 %775 }
 0x2cf   :  { %v796_v34 = vsub.f32 %v428_v8, %v776_v33  ;;  %v773_v35 = vpop.xlane.xlu0 %772 }
 0x2d0   :  { %v795_v36 = vsub.f32 %v423_v10, %v773_v35 }
 0x2d1   :  { %v805_v37 = vmul.f32 1.442695, %v796_v34 }
 0x2d2   :  { %v803_v38 = vmul.f32 1.442695, %v795_v36  ;;  %v782_v39 = vpop.xlane.xlu1 %781 }
 0x2d3   :  { %1915 = vpow2.f32 %v805_v37  ;;  %v798_v40 = vsub.f32 %v541_v14, %v782_v39 }
 0x2d4   :  { %1917 = vpow2.f32 %v803_v38 }
 0x2d5   :  { %v809_v41 = vmul.f32 1.442695, %v798_v40 }
 0x2d6   :  { %v779_v42 = vpop.xlane.xlu1 %778 }
 0x2d7   :  { %1919 = vpow2.f32 %v809_v41  ;;  %v797_v43 = vsub.f32 %v536_v16, %v779_v42  ;;  %v785_v44 = vpop.xlane.xlu0 %784  ;;  %v83_v16 = vld [vmem:[%s2326_s3 + $0x50] sm:$0xff] }
 0x2d8   :  { %v799_v45 = vsub.f32 %v649_v20, %v785_v44 }
 0x2d9   :  { %v807_v46 = vmul.f32 1.442695, %v797_v43 }
 0x2da   :  { %v811_v47 = vmul.f32 1.442695, %v799_v45  ;;  %v788_v52 = vpop.xlane.xlu1 %787 }
 0x2db   :  { %1921 = vpow2.f32 %v807_v46  ;;  %v800_v53 = vsub.f32 %v654_v21, %v788_v52 }
 0x2dc   :  { %1923 = vpow2.f32 %v811_v47 }
 0x2dd   :  { %v1916_v54 = vpop.eup %1915  ;;  %v813_v55 = vmul.f32 1.442695, %v800_v53 }
 0x2de   :  { %v1918_v56 = vpop.eup %1917  ;;  %v794_v57 = vpop.xlane.xlu1 %793  ;;  %v822_v58 = vsel %vm770_vm5, %v1916_v54, 0.0 }
 0x2df   :  { %1925 = vpow2.f32 %v813_v55  ;;  %v802_v59 = vsub.f32 %v767_v26, %v794_v57  ;;  %823 = vadd.xlane.f32.xlu1 %v822_v58  ;;  %v791_v60 = vpop.xlane.xlu0 %790  ;;  %v819_v61 = vsel %vm770_vm5, %v1918_v56, 0.0 }
 0x2e0   :  { %v801_v62 = vsub.f32 %v762_v28, %v791_v60  ;;  %820 = vadd.xlane.f32.xlu0 %v819_v61  ;;  %v1177_v60 = vld [vmem:[%s2327_s4 + $0x8] sm:$0xff] }
 0x2e1   :  { %v1920_v63 = vpop.eup %1919  ;;  %v817_v3 = vmul.f32 1.442695, %v802_v59 }
 0x2e2   :  { %v815_v4 = vmul.f32 1.442695, %v801_v62  ;;  %v828_v5 = vsel %vm770_vm5, %v1920_v63, 0.0  ;;  %v133_v20 = vpop.permute.xlu1 %132 }
 0x2e3   :  { %1927 = vpow2.f32 %v817_v3  ;;  %829 = vadd.xlane.f32.xlu1 %v828_v5 }
 0x2e4   :  { %1929 = vpow2.f32 %v815_v4 }
 0x2e5   :  { %v1922_v6 = vpop.eup %1921 }
 0x2e6   :  { %v825_v7 = vsel %vm770_vm5, %v1922_v6, 0.0  ;;  %v1924_v8 = vpop.eup %1923 }
 0x2e7   :  { %826 = vadd.xlane.f32.xlu0 %v825_v7  ;;  %v831_v11 = vsel %vm770_vm5, %v1924_v8, 0.0  ;;  %v128_v21 = vpop.permute.xlu0 %127 }
 0x2e8   :  { %v295_v40 = vadd.f32 %v2128_v49, %v128_v21  ;;  %v300_v49 = vadd.f32 %v2126_v48, %v133_v20  ;;  %v1176_v48 = vld [vmem:[%s2327_s4] sm:$0xff] }
 0x2e9   :  { %v1926_v9 = vpop.eup %1925  ;;  %v1856_v61 = vpack.c.bf16 %v1177_v60, %v1176_v48  ;;  %v1450_v60 = vld [vmem:[%s2329_s6 + $0x10] sm:$0xff] }
 0x2ea   :  { %v834_v10 = vsel %vm770_vm5, %v1926_v9, 0.0 }
 0x2eb   :  { %835 = vadd.xlane.f32.xlu1 %v834_v10  ;;  %832 = vadd.xlane.f32.xlu0 %v831_v11 }
 0x2ed   :  { %v1928_v12 = vpop.eup %1927 }
 0x2ee   :  { %v1930_v13 = vpop.eup %1929  ;;  %v840_v14 = vsel %vm770_vm5, %v1928_v12, 0.0 }
 0x2ef   :  { %841 = vadd.xlane.f32.xlu1 %v840_v14  ;;  %v837_v15 = vsel %vm770_vm5, %v1930_v13, 0.0  ;;  %v2221_v14 = vld [vmem:[%s2330_s7] sm:$0x3f] }
 0x2f0   :  { %838 = vadd.xlane.f32.xlu0 %v837_v15 }
 0x300   :  { %137 = vperm.xlu1 %1914, %v83_v16  }
 0x306   :  { %142 = vperm.xlu0 %1913, %v84_v18  }
 0x36c   :  { %v824_v22 = vpop.xlane.xlu1 %823 }
 0x36d   :  { %1931 = vrcp.f32 %v824_v22  ;;  %v821_v23 = vpop.xlane.xlu0 %820 }
 0x36e   :  { %1933 = vrcp.f32 %v821_v23 }
 0x370   :  { %v830_v24 = vpop.xlane.xlu1 %829 }
 0x371   :  { %1935 = vrcp.f32 %v830_v24 }
 0x374   :  { %v827_v25 = vpop.xlane.xlu0 %826 }
 0x375   :  { %1937 = vrcp.f32 %v827_v25 }
 0x377   :  { %v1932_v26 = vpop.eup %1931 }
 0x378   :  { %v1934_v27 = vpop.eup %1933  ;;  %v852_v28 = vmul.f32 %v1932_v26, %v1916_v54  ;;  %v836_v29 = vpop.xlane.xlu1 %835 }
 0x379   :  { %v833_v30 = vpop.xlane.xlu0 %832  ;;  %v851_v31 = vmul.f32 %v1934_v27, %v1918_v56  ;;  %1939 = vrcp.f32 %v836_v29 }
 0x37a   :  { %1941 = vrcp.f32 %v833_v30 }
 0x37b   :  { %v1841_v33 = vpack.c.bf16 %v852_v28, %v851_v31  ;;  %v1936_v35 = vpop.eup %1935 }
 0x37c   :  { %v842_v34 = vpop.xlane.xlu1 %841  ;;  %v854_v38 = vmul.f32 %v1936_v35, %v1920_v63  ;;  %v1179_v63 = vld [vmem:[%s2327_s4 + $0x18] sm:$0xff] }
 0x37d   :  { %1943 = vrcp.f32 %v842_v34  ;;  %1843 = vmatpush3.bf16.xpose.msk.msra.mxu1 %vm2178_vm7, %v1841_v33  ;;  %v839_v36 = vpop.xlane.xlu0 %838  ;;  %v1340_v34 = vld [vmem:[%s2328_s5 + $0x10] sm:$0xff]  ;;  %v1341_v35 = vld [vmem:[%s2328_s5 + $0x18] sm:$0xff] }
 0x37e   :  { %1945 = vrcp.f32 %v839_v36  ;;  %1844 = vmatprep.subr.bf16.mxu1 %v1984_v17  ;;  %v1868_v36 = vpack.c.bf16 %v1341_v35, %v1340_v34 }
 0x37f   :  { %v1938_v37 = vpop.eup %1937 }
 0x380   :  { %v853_v39 = vmul.f32 %v1938_v37, %v1922_v6  ;;  %v138_v55 = vpop.permute.xlu1 %137  ;;  %v1448_v37 = vld [vmem:[%s2329_s6] sm:$0xff] }
 0x381   :  { %v305_v57 = vadd.f32 %v2132_v51, %v138_v55 }
 0x382   :  { %v1845_v41 = vpack.c.bf16 %v854_v38, %v853_v39  ;;  %v1449_v38 = vld [vmem:[%s2329_s6 + $0x8] sm:$0xff] }
 0x383   :  { %v1940_v42 = vpop.eup %1939  ;;  %v1872_v39 = vpack.c.bf16 %v1449_v38, %v1448_v37 }
 0x384   :  { %v1942_v43 = vpop.eup %1941  ;;  %v856_v44 = vmul.f32 %v1940_v42, %v1926_v9  ;;  %1754 = vmatmul.mubr.msk.f32.vlgmr.msra.gmra.mrb[12].mxu1 %vm770_vm5, %v295_v40 }
 0x385   :  { %v855_v45 = vmul.f32 %v1942_v43, %v1924_v8  ;;  %1847 = vmatpush3.bf16.xpose.msk.msra.mxu1 %vm2178_vm7, %v1845_v41  ;;  %1760 = vmatprep.mubr.msk.f32.mxu1 %vm1985_vm6, %v1986_v19  ;;  %v143_v58 = vpop.permute.xlu0 %142 }
 0x386   :  { %1852 = vmatprep.subr.bf16.mxu1 %v1984_v17  ;;  %v310_v59 = vadd.f32 %v2130_v50, %v143_v58  ;;  %v1178_v50 = vld [vmem:[%s2327_s4 + $0x10] sm:$0xff] }
 0x387   :  { %v1944_v46 = vpop.eup %1943  ;;  %v1849_v47 = vpack.c.bf16 %v856_v44, %v855_v45  ;;  %v1860_v3 = vpack.c.bf16 %v1179_v63, %v1178_v50  ;;  %v1453_v50 = vld [vmem:[%s2329_s6 + $0x28] sm:$0xff] }
 0x388   :  { %v1946_v52 = vpop.eup %1945  ;;  %v858_v53 = vmul.f32 %v1944_v46, %v1928_v12  ;;  %v2215_v12 = vshrl.u32 %v39_v2, 7 }
 0x389   :  { %v857_v54 = vmul.f32 %v1946_v52, %v1930_v13  ;;  %1851 = vmatpush3.bf16.xpose.msk.msra.mxu0 %vm2178_vm7, %v1849_v47 }
 0x38a   :  { %1857 = vmatprep.subr.bf16.mxu0 %v1856_v61  ;;  %v1182_v13 = vsub.s32 0, %v2215_v12  ;;  %v1328_v46 = vsub.s32 1, %v2215_v12  ;;  %v1334_v47 = vsub.s32 2, %v2215_v12 }
 0x38b   :  { %v1853_v56 = vpack.c.bf16 %v858_v53, %v857_v54 }
 0x38c   :  { %1761 = vmatmul.mubr.msk.f32.vlgmr.msra.gmra.mrb[14].mxu1 %vm770_vm5, %v300_v49  ;;  %v1183_v15 = vrot.slane %v2221_v14, %v1182_v13  ;;  %v1329_v52 = vrot.slane %v2221_v14, %v1328_v46  ;;  %v1335_v49 = vrot.slane %v2221_v14, %v1334_v47  ;;  %v1460_v13 = vld [vmem:[%s2329_s6 + $0x60] sm:$0xff] }
 0x38d   :  { %1855 = vmatpush3.bf16.xpose.msk.msra.mxu1 %vm2178_vm7, %v1853_v56  ;;  %1774 = vmatprep.mubr.msk.f32.mxu1 %vm1985_vm6, %v1986_v19 }
 0x390   :  { %1768 = vmatmul.mubr.msk.f32.vlgmr.msra.gmra.mrb[8].mxu0 %vm770_vm5, %v305_v57 }
 0x391   :  { %1859 = vmatpush3.bf16.msra.mxu0 %v1856_v61  ;;  %v1451_v61 = vld [vmem:[%s2329_s6 + $0x18] sm:$0xff] }
 0x392   :  { %1861 = vmatprep.subr.bf16.mxu0 %v1860_v3 }
 0x394   :  { %1775 = vmatmul.mubr.msk.f32.vlgmr.msra.gmra.mrb[16].mxu1 %vm770_vm5, %v310_v59 }
 0x395   :  { %1863 = vmatpush3.bf16.msra.mxu0 %v1860_v3  ;;  %v1454_v3 = vld [vmem:[%s2329_s6 + $0x30] sm:$0xff] }
 0x396   :  { %1873 = vmatprep.subr.bf16.mxu0 %v1872_v39 }
 0x457   :  { %v934_v62 = vpop.f32.mrb[12].mxu1 }
 0x458   :  { %1184 = vxpose.xlu1.b32.start [1/4] (short) (narrow) %v934_v62, 16  ;;  %v1755_v51 = vpop.f32.mrb[13].mxu1  ;;  %v1876_v62 = vpack.c.bf16 %v1451_v61, %v1450_v60 }
 0x459   :  { %v1452_v51 = vld [vmem:[%s2329_s6 + $0x20] sm:$0xff] }
 0x45a   :  { %v1880_v63 = vpack.c.bf16 %v1453_v50, %v1452_v51 }
 0x45f   :  { %v1013_v4 = vpop.f32.mrb[14].mxu1 }
 0x460   :  { %1185 = vxpose.xlu1.b32.cont [2/4] (short) (narrow) %v1013_v4, 16  ;;  %v1762_v5 = vpop.f32.mrb[15].mxu1  ;;  %v1455_v4 = vld [vmem:[%s2329_s6 + $0x38] sm:$0xff] }
 0x461   :  { %v1884_v5 = vpack.c.bf16 %v1455_v4, %v1454_v3  ;;  %v1571_v3 = vsub.s32 4, %v2215_v12  ;;  %v1577_v4 = vsub.s32 5, %v2215_v12 }
 0x463   :  { %v1092_v6 = vpop.f32.mrb[8].mxu0 }
 0x464   :  { %v1769_v7 = vpop.f32.mrb[9].mxu0  ;;  %1186 = vxpose.xlu1.b32.cont [3/4] (short) (narrow) %v1092_v6, 16  ;;  %v1456_v6 = vld [vmem:[%s2329_s6 + $0x40] sm:$0xff] }
 0x465   :  { %v1457_v7 = vld [vmem:[%s2329_s6 + $0x48] sm:$0xff] }
 0x467   :  { %v1171_v8 = vpop.f32.mrb[16].mxu1 }
 0x468   :  { %1187 = vxpose.xlu1.b32.end [4/4] (short) (narrow) %v1171_v8, 16  ;;  %v1776_v9 = vpop.f32.mrb[17].mxu1  ;;  %v1888_v8 = vpack.c.bf16 %v1457_v7, %v1456_v6 }
 0x469   :  { %v1458_v9 = vld [vmem:[%s2329_s6 + $0x50] sm:$0xff] }
 0x4dc   :  { %v1200_v10 = vpop.trf.xlu1 }
 0x4dd   :  { %1785 = vmatprep.mubr.msk.f32.mxu0 %vm145_vm0, %v1200_v10  ;;  %v1459_v10 = vld [vmem:[%s2329_s6 + $0x58] sm:$0xff] }
 0x4e0   :  { %v1201_v11 = vpop.trf.xlu1 }
 0x4e1   :  { %1786 = vmatmul.mubr.msk.f32.vlgmr.msra.gmra.mrb[10].mxu0 %vm145_vm0, %v1201_v11  ;;  %v1892_v11 = vpack.c.bf16 %v1459_v10, %v1458_v9 }
 0x4e2   :  { %1875 = vmatpush3.bf16.msra.mxu0 %v1872_v39 }
 0x4e3   :  { %1877 = vmatprep.subr.bf16.mxu0 %v1876_v62 }
 0x4e6   :  { %1879 = vmatpush3.bf16.msra.mxu0 %v1876_v62 }
 0x4e7   :  { %1881 = vmatprep.subr.bf16.mxu0 %v1880_v63 }
 0x4ea   :  { %1883 = vmatpush3.bf16.msra.mxu0 %v1880_v63 }
 0x4eb   :  { %1885 = vmatprep.subr.bf16.mxu0 %v1884_v5 }
 0x4ee   :  { %1887 = vmatpush3.bf16.msra.mxu0 %v1884_v5  ;;  %v1572_v5 = vrot.slane %v2221_v14, %v1571_v3 }
 0x4ef   :  { %1889 = vmatprep.subr.bf16.mxu0 %v1888_v8 }
 0x4f2   :  { %1891 = vmatpush3.bf16.msra.mxu0 %v1888_v8  ;;  %v1578_v8 = vrot.slane %v2221_v14, %v1577_v4 }
 0x4f3   :  { %1893 = vmatprep.subr.bf16.mxu0 %v1892_v11 }
 0x4f6   :  { %1895 = vmatpush3.bf16.msra.mxu0 %v1892_v11 }
 0x5b4   :  { %v1787_v16 = vpop.f32.mrb[10].mxu0 }
 0x5b5   :  { %v1288_v17 = vpop.f32.mrb[11].mxu0  ;;  %v1294_v18 = vadd.f32 %v1787_v16, %v1183_v15 }
 0x5b6   :  { %v1289_v19 = vadd.f32 %v1288_v17, %v1183_v15  ;;  %v1461_v15 = vld [vmem:[%s2329_s6 + $0x68] sm:$0xff]  ;;  %v1462_v17 = vld [vmem:[%s2329_s6 + $0x70] sm:$0xff] }
 0x5b7   :  { %v1298_v2 = vadd.f32 %v1294_v18, %v2048_v1  ;;  %v1338_v1 = vld [vmem:[%s2328_s5] sm:$0xff]  ;;  %v1896_v16 = vpack.c.bf16 %v1461_v15, %v1460_v13  ;;  %v1463_v18 = vld [vmem:[%s2329_s6 + $0x78] sm:$0xff]  ;;  %s1987_s6 = smov [#allocation2]  }
 0x5b8   :  { %v1297_v20 = vadd.f32 %v1289_v19, %v2043_v0  ;;  %v1864_v33 = vpack.c.bf16 %v1339_v32, %v1338_v1  ;;  %v1900_v19 = vpack.c.bf16 %v1463_v18, %v1462_v17 }
 0x5b9   :  { %v1302_v22 = vsel %vm145_vm0, %v1298_v2, 0.0  ;;  %1897 = vmatprep.subr.bf16.mxu0 %v1896_v16 }
 0x5ba   :  { %v1299_v21 = vsel %vm145_vm0, %v1297_v20, 0.0  ;;  %1865 = vmatprep.subr.bf16.mxu1 %v1864_v33  ;;  %1899 = vmatpush3.bf16.msra.mxu0 %v1896_v16 }
 0x5bb   :  { %1300 = vadd.xlane.f32.xlu0 %v1299_v21  ;;  %1867 = vmatpush3.bf16.msra.mxu1 %v1864_v33 }
 0x5bc   :  { %1869 = vmatprep.subr.bf16.mxu1 %v1868_v36  ;;  %1901 = vmatprep.subr.bf16.mxu0 %v1900_v19 }
 0x5be   :  { %1903 = vmatpush3.bf16.msra.mxu0 %v1900_v19 }
 0x5bf   :  { %1303 = vadd.xlane.f32.xlu0 %v1302_v22  ;;  %1871 = vmatpush3.bf16.msra.mxu1 %v1868_v36 }
 0x648   :  { %v1301_v23 = vpop.xlane.xlu0 %1300 }
 0x649   :  { %v1306_v24 = vmul.f32 0.03125, %v1301_v23 }
 0x64b   :  { %v1308_v25 = vsub.f32 %v1297_v20, %v1306_v24  ;;  %v1636_v20 = vld [vmem:[%s2331_s8] ss:$0 sm:$0xff]  ;;  %s1588_s8 = sshll.u32 %s1987_s6, 4  ;;  %s1589_s8 = int_to_ptr.vmem [resolvable:$true] %s1588_s8 }
 0x64c   :  { %v1304_v26 = vpop.xlane.xlu0 %1303  ;;  %s1959_s13 = scalar_lea.vmem %s1589_s8, 256  ;;  %p1964_p1 = scmp.lt.s32.totalorder %s1589_s8, %s1589_s8 }
 0x64d   :  { %v1307_v27 = vmul.f32 0.03125, %v1304_v26  ;;  %v1310_v28 = vmul.f32 %v1308_v25, %v1308_v25  ;;  %p1960_p0 = scmp.ne.s32.totalorder %s1589_s8, %s1959_s13  ;;  %p1965_p2 = scmp.lt.s32.totalorder %s1959_s13, %s1959_s13 }
 0x64f   :  { %v1309_v29 = vsub.f32 %v1298_v2, %v1307_v27  ;;  %v1312_v30 = vsel %vm145_vm0, %v1310_v28, 0.0  ;;  %p1966_p3 = por %p1965_p2, %p1964_p1 }
 0x650   :  { %1313 = vadd.xlane.f32.xlu0 %v1312_v30 }
 0x651   :  { %v1311_v31 = vmul.f32 %v1309_v29, %v1309_v29  ;;  %p1967_p4 = pnand %p1966_p3, %p1960_p0 }
 0x653   :  { %v1315_v0 = vsel %vm145_vm0, %v1311_v31, 0.0 }
 0x654   :  { %1316 = vadd.xlane.f32.xlu0 %v1315_v0 }
 0x6dd   :  { %v1314_v40 = vpop.xlane.xlu0 %1313 }
 0x6de   :  { %v1318_v41 = vmul.f32 0.03125, %v1314_v40  ;;  %v1466_v40 = vsub.s32 3, %v2215_v12 }
 0x6e0   :  { %v1320_v42 = vadd.f32 1e-12, %v1318_v41  ;;  %v1467_v41 = vrot.slane %v2221_v14, %v1466_v40 }
 0x6e1   :  { %v1317_v43 = vpop.xlane.xlu0 %1316 }
 0x6e2   :  { %1947 = vrsqrt.f32 %v1320_v42  ;;  %v1319_v44 = vmul.f32 0.03125, %v1317_v43 }
 0x6e4   :  { %v1321_v45 = vadd.f32 1e-12, %v1319_v44 }
 0x6e6   :  { %1949 = vrsqrt.f32 %v1321_v45 }
 0x6ec   :  { %v1948_v53 = vpop.eup %1947 }
 0x6ed   :  { %v1324_v54 = vmul.f32 %v1948_v53, %v1308_v25 }
 0x6ef   :  { %v1330_v55 = vmul.f32 %v1329_v52, %v1324_v54 }
 0x6f0   :  { %v1950_v56 = vpop.eup %1949 }
 0x6f1   :  { %v1325_v57 = vmul.f32 %v1950_v56, %v1309_v29  ;;  %v1336_v58 = vadd.f32 %v1335_v49, %v1330_v55 }
 0x6f3   :  { %v1331_v59 = vmul.f32 %v1329_v52, %v1325_v57  ;;  %1796 = vmatprep.mubr.msk.f32.mxu1 %vm145_vm0, %v1336_v58 }
 0x6f5   :  { %v1337_v48 = vadd.f32 %v1335_v49, %v1331_v59 }
 0x6f7   :  { %1797 = vmatmul.mubr.msk.f32.vlgmr.msra.gmra.mrb[18].mxu1 %vm145_vm0, %v1337_v48 }
 0x7ca   :  { %v1798_v21 = vpop.f32.mrb[18].mxu1 }
 0x7cb   :  { %v1427_v2 = vadd.f32 %v1798_v21, %v1636_v20  ;;  %v1421_v22 = vpop.f32.mrb[19].mxu1 }
 0x7cc   :  { %v1422_v23 = vadd.f32 %v1636_v20, %v1421_v22 }
 0x7cd   :  { %v1433_v24 = vmul.f32 0.044715, %v1427_v2  ;;  %v1431_v37 = vmul.f32 0.5, %v1427_v2 }
 0x7ce   :  { %v1432_v25 = vmul.f32 0.044715, %v1422_v23  ;;  %v1430_v35 = vmul.f32 0.5, %v1422_v23 }
 0x7cf   :  { %v1435_v26 = vmul.f32 %v1433_v24, %v1427_v2 }
 0x7d0   :  { %v1434_v27 = vmul.f32 %v1432_v25, %v1422_v23 }
 0x7d1   :  { %v1437_v28 = vmul.f32 %v1435_v26, %v1427_v2 }
 0x7d2   :  { %v1436_v29 = vmul.f32 %v1434_v27, %v1422_v23 }
 0x7d3   :  { %v1439_v30 = vadd.f32 %v1437_v28, %v1427_v2 }
 0x7d4   :  { %v1438_v31 = vadd.f32 %v1436_v29, %v1422_v23 }
 0x7d5   :  { %v1441_v0 = vmul.f32 0.7978846, %v1439_v30 }
 0x7d6   :  { %v1440_v1 = vmul.f32 0.7978846, %v1438_v31 }
 0x7d7   :  { %1951 = vtanh.f32 %v1441_v0 }
 0x7d8   :  { %1953 = vtanh.f32 %v1440_v1 }
 0x7e1   :  { %v1952_v32 = vpop.eup %1951 }
 0x7e2   :  { %v1954_v33 = vpop.eup %1953  ;;  %v1445_v34 = vadd.f32 1.0, %v1952_v32 }
 0x7e3   :  { %v1444_v36 = vadd.f32 1.0, %v1954_v33 }
 0x7e4   :  { %v1447_v39 = vmul.f32 %v1445_v34, %v1431_v37 }
 0x7e5   :  { %v1446_v38 = vmul.f32 %v1444_v36, %v1430_v35 }
 0x7e7   :  { %1831 = vmatprep.mubr.f32.mxu0 %v1446_v38 }
 0x7e8   :  { %1832 = vmatmul.mubr.f32.vlgmr.msra.gmra.mrb[12].mxu0 %v1447_v39 }
 0x8bb   :  { %v1833_v42 = vpop.f32.mrb[12].mxu0 }
 0x8bc   :  { %v1534_v43 = vpop.f32.mrb[13].mxu0  ;;  %v1540_v45 = vadd.f32 %v1833_v42, %v1467_v41 }
 0x8bd   :  { %v1535_v44 = vadd.f32 %v1534_v43, %v1467_v41 }
 0x8be   :  { %v1546_v47 = vsel %vm145_vm0, %v1540_v45, 0.0 }
 0x8bf   :  { %v1543_v46 = vsel %vm145_vm0, %v1535_v44, 0.0 }
 0x8c0   :  { %1544 = vadd.xlane.f32.xlu0 %v1543_v46 }
 0x8c4   :  { %1547 = vadd.xlane.f32.xlu0 %v1546_v47 }
 0x94d   :  { %v1545_v52 = vpop.xlane.xlu0 %1544 }
 0x94e   :  { %v1549_v53 = vmul.f32 0.03125, %v1545_v52 }
 0x950   :  { %v1551_v54 = vsub.f32 %v1535_v44, %v1549_v53 }
 0x951   :  { %v1548_v49 = vpop.xlane.xlu0 %1547 }
 0x952   :  { %v1550_v55 = vmul.f32 0.03125, %v1548_v49  ;;  %v1553_v56 = vmul.f32 %v1551_v54, %v1551_v54 }
 0x954   :  { %v1552_v57 = vsub.f32 %v1540_v45, %v1550_v55  ;;  %v1555_v58 = vsel %vm145_vm0, %v1553_v56, 0.0 }
 0x955   :  { %1556 = vadd.xlane.f32.xlu0 %v1555_v58 }
 0x956   :  { %v1554_v59 = vmul.f32 %v1552_v57, %v1552_v57 }
 0x958   :  { %v1558_v48 = vsel %vm145_vm0, %v1554_v59, 0.0 }
 0x959   :  { %1559 = vadd.xlane.f32.xlu1 %v1558_v48 }
 0x9e2   :  { %v1557_v60 = vpop.xlane.xlu0 %1556 }
 0x9e3   :  { %v1561_v61 = vmul.f32 0.03125, %v1557_v60 }
 0x9e5   :  { %v1563_v62 = vadd.f32 1e-12, %v1561_v61 }
 0x9e6   :  { %v1560_v51 = vpop.xlane.xlu1 %1559 }
 0x9e7   :  { %1955 = vrsqrt.f32 %v1563_v62  ;;  %v1562_v50 = vmul.f32 0.03125, %v1560_v51 }
 0x9e9   :  { %v1564_v63 = vadd.f32 1e-12, %v1562_v50 }
 0x9eb   :  { %1957 = vrsqrt.f32 %v1564_v63 }
 0x9f1   :  { %v1956_v6 = vpop.eup %1955 }
 0x9f2   :  { %v1567_v7 = vmul.f32 %v1956_v6, %v1551_v54 }
 0x9f4   :  { %v1573_v9 = vmul.f32 %v1572_v5, %v1567_v7 }
 0x9f5   :  { %v1958_v10 = vpop.eup %1957 }
 0x9f6   :  { %v1568_v11 = vmul.f32 %v1958_v10, %v1552_v57  ;;  %v1579_v13 = vadd.f32 %v1578_v8, %v1573_v9 }
 0x9f8   :  { %v1574_v15 = vmul.f32 %v1572_v5, %v1568_v11  ;;  %1581 = vst.msk [vmem:[#allocation2] sm:$0xff] %vm145_vm0, %v1579_v13 }
 0x9fa   :  { %v1580_v16 = vadd.f32 %v1578_v8, %v1574_v15 }
 0x9fc   :  { %1582 = vst.msk [vmem:[#allocation2 + $0x8] sm:$0xff] %vm145_vm0, %v1580_v16 }
 0x9fd   :  { %1970 = shalt.err (!%p1967_p4)
}
 0x9fe   :  { %s1971_s0 = scalar_lea.hbm %s2332_s9, 256 }
 0x9ff   :  { %p1972_p5 = scmp.ne.s32.totalorder %s2332_s9, %s1971_s0  ;;  %p1975_p6 = scmp.lt.u32.totalorder %s1971_s0, %s2332_s9 }
 0xa01   :  { %p1977_p7 = pnand %p1975_p6, %p1972_p5 }
 0xa03   :  { %1980 = shalt.err (!%p1977_p7)
}
 0xa04   :  { %s1988_s19 = smov 128   ;;  %s1989_s20 = smov 8  }
 0xa05   :  { %1594 = dma.vmem_to_hbm [thread:$0]  %s1589_s8, 256, %s2332_s9, [#allocation3], %s1988_s19, %s1988_s19, %s1989_s20  }
 0xa06   :  { %1981 = dma.done.wait [#allocation3], 256  }
 0xa07   :  { %1982 = vsyncadd [#allocation3], 4294967040 }
 0xa08   :  { %1598 = vsyncpa [#allocation3], 1 }

</bundles_post_ra>
